<compile_context>
chip_gen: v6e
topology: v6e:2x2x1
jax: 0.10.0
libtpu: 0.0.40
codegen_flags: <defaults>
</compile_context>

<pallas_src>
import jax
import jax.numpy as jnp
from jax.experimental import pallas as pl
from jax.experimental.pallas import tpu as pltpu


def bigram_kernel(idx_ref, tgt_ref, table_ref, logits_ref, nll_ref):
    # idx_ref / tgt_ref : (TN, 1) int32 token ids / targets for this block
    # table_ref         : (V, V)  f32 full embedding table (resident in VMEM)
    # logits_ref        : (TN, V) f32 output logits block
    # nll_ref           : (TN, 1) f32 per-row negative log-likelihood
    tn = idx_ref.shape[0]
    v = table_ref.shape[0]

    ids = idx_ref[...]                                     # (TN, 1) int32
    tgt = tgt_ref[...]                                     # (TN, 1) int32
    col = jax.lax.broadcasted_iota(jnp.int32, (tn, v), 1)  # (TN, V) lane ids

    # Embedding gather as one-hot matmul on the MXU: logits = onehot(ids) @ table.
    onehot = (col == ids).astype(jnp.float32)              # (TN, V)
    logits = jnp.dot(onehot, table_ref[...],
                     preferred_element_type=jnp.float32)   # (TN, V)
    logits_ref[...] = logits

    # Numerically-stable cross-entropy over the vocab (lane) axis.
    m = jnp.max(logits, axis=-1, keepdims=True)            # (TN, 1)
    lse = jnp.log(jnp.sum(jnp.exp(logits - m), axis=-1, keepdims=True)) + m
    # Target logit via masked lane reduce (no second one-hot / matmul needed).
    tgt_logit = jnp.sum(jnp.where(col == tgt, logits, 0.0),
                        axis=-1, keepdims=True)            # (TN, 1)
    # TODO(synk): F.cross_entropy's ignore_index=-100 path is not handled (unused here).
    nll_ref[...] = lse - tgt_logit


def bigram_forward(idx, targets, table, tn=256):
    B, T = idx.shape
    V = table.shape[0]
    N = B * T

    # Token-block size: whole problem in one step when small, else 256-row tiles.
    TN = N if N <= tn else tn
    N_pad = ((N + TN - 1) // TN) * TN

    idx_flat = idx.reshape(N).astype(jnp.int32)
    tgt_flat = targets.reshape(N).astype(jnp.int32)
    if N_pad != N:
        pad = N_pad - N
        idx_flat = jnp.concatenate([idx_flat, jnp.zeros((pad,), jnp.int32)])
        tgt_flat = jnp.concatenate([tgt_flat, jnp.zeros((pad,), jnp.int32)])
    idx2 = idx_flat.reshape(N_pad, 1)
    tgt2 = tgt_flat.reshape(N_pad, 1)
    table_f32 = table.astype(jnp.float32)

    num_blocks = N_pad // TN

    logits_pad, nll_pad = pl.pallas_call(
        bigram_kernel,
        out_shape=(
            jax.ShapeDtypeStruct((N_pad, V), jnp.float32),
            jax.ShapeDtypeStruct((N_pad, 1), jnp.float32),
        ),
        grid_spec=pltpu.PrefetchScalarGridSpec(
            num_scalar_prefetch=0,
            grid=(num_blocks,),
            in_specs=[
                pl.BlockSpec((TN, 1), lambda i: (i, 0)),   # idx block
                pl.BlockSpec((TN, 1), lambda i: (i, 0)),   # target block
                pl.BlockSpec((V, V), lambda i: (0, 0)),    # table resident in VMEM
            ],
            out_specs=(
                pl.BlockSpec((TN, V), lambda i: (i, 0)),   # logits (lane-dense)
                pl.BlockSpec((TN, 1), lambda i: (i, 0)),   # per-row NLL
            ),
        ),
        compiler_params=pltpu.CompilerParams(
            dimension_semantics=("parallel",)),            # independent token blocks
    )(idx2, tgt2, table_f32)

    logits = logits_pad[:N]
    loss = jnp.sum(nll_pad[:N, 0]) / N                     # mean over real rows only
    return logits, loss


def reference_forward(idx, targets, table):
    logits = table[idx]                                    # (B, T, V)
    B, T, C = logits.shape
    logits = logits.reshape(B * T, C)
    targets = targets.reshape(B * T)
    lse = jax.nn.logsumexp(logits, axis=-1)
    tgt_logit = jnp.take_along_axis(logits, targets[:, None], axis=-1)[:, 0]
    loss = jnp.mean(lse - tgt_logit)
    return logits, loss


if __name__ == "__main__":
    vocab_size = 32
    B, T = 2, 8

    key = jax.random.PRNGKey(0)
    k_tab, k_idx, k_tgt = jax.random.split(key, 3)

    # nn.Embedding default init: N(0, 1)
    table = jax.random.normal(k_tab, (vocab_size, vocab_size), dtype=jnp.float32)
    idx = jax.random.randint(k_idx, (B, T), 0, vocab_size, dtype=jnp.int32)
    targets = jax.random.randint(k_tgt, (B, T), 0, vocab_size, dtype=jnp.int32)

    logits, loss = bigram_forward(idx, targets, table)
    jax.block_until_ready((logits, loss))

    ref_logits, ref_loss = reference_forward(idx, targets, table)
    assert jnp.allclose(logits, ref_logits, atol=1e-5), "logits mismatch"
    assert jnp.allclose(loss, ref_loss, atol=1e-5), "loss mismatch"

    print("KERNEL_OK")
</pallas_src>

<mosaic_0001>
module attributes {stable_mosaic.version = 11 : i64} {
  func.func @bigram_kernel(%arg0: i32, %arg1: memref<16x1xi32, #tpu.memory_space<vmem>>, %arg2: memref<16x1xi32, #tpu.memory_space<vmem>>, %arg3: memref<32x32xf32, #tpu.memory_space<vmem>>, %arg4: memref<16x32xf32, #tpu.memory_space<vmem>>, %arg5: memref<16x1xf32, #tpu.memory_space<vmem>>) attributes {dimension_semantics = [#tpu.dimension_semantics<parallel>], iteration_bounds = array<i64: 1>, scalar_prefetch = 0 : i64, scratch_operands = 0 : i64, tpu.core_type = #tpu.core_type<tc>, window_params = [{transform_indices = @transform_0, window_bounds = array<i64: 16, 1>}, {transform_indices = @transform_1, window_bounds = array<i64: 16, 1>}, {pipeline_mode = #tpu.pipeline_mode<synchronous>, transform_indices = @transform_2, window_bounds = array<i64: 32, 32>}, {transform_indices = @transform_3, window_bounds = array<i64: 16, 32>}, {transform_indices = @transform_4, window_bounds = array<i64: 16, 1>}]} {
    %c0 = arith.constant 0 : index
    %c0_0 = arith.constant 0 : index
    %0 = vector.load %arg1[%c0, %c0_0] : memref<16x1xi32, #tpu.memory_space<vmem>>, vector<16x1xi32>
    %c0_1 = arith.constant 0 : index
    %c0_2 = arith.constant 0 : index
    %1 = vector.load %arg2[%c0_1, %c0_2] : memref<16x1xi32, #tpu.memory_space<vmem>>, vector<16x1xi32>
    %2 = tpu.iota {dimensions = array<i32: 1>} : vector<16x32xi32>
    %3 = vector.broadcast %0 : vector<16x1xi32> to vector<16x32xi32>
    %4 = arith.cmpi eq, %2, %3 : vector<16x32xi32>
    %5 = arith.extui %4 : vector<16x32xi1> to vector<16x32xi32>
    %6 = arith.sitofp %5 : vector<16x32xi32> to vector<16x32xf32>
    %c0_3 = arith.constant 0 : index
    %c0_4 = arith.constant 0 : index
    %7 = vector.load %arg3[%c0_3, %c0_4] : memref<32x32xf32, #tpu.memory_space<vmem>>, vector<32x32xf32>
    %cst = arith.constant dense<0.000000e+00> : vector<16x32xf32>
    %8 = tpu.matmul %6, %7, %cst {dimension_numbers = #tpu.dot_dimension_numbers<[1], [0], [0], [1], [0, 0, 1, 1], [], []>} : vector<16x32xf32>, vector<32x32xf32>, vector<16x32xf32> -> vector<16x32xf32>
    %c0_5 = arith.constant 0 : index
    %c0_6 = arith.constant 0 : index
    %9 = vector.load %arg4[%c0_5, %c0_6] : memref<16x32xf32, #tpu.memory_space<vmem>>, vector<16x32xf32>
    tpu.vector_store %arg4[%c0_5, %c0_6], %8 {strides = array<i32>} : memref<16x32xf32, #tpu.memory_space<vmem>>, vector<16x32xf32>,
    %cst_7 = arith.constant dense<0xFF800000> : vector<16xf32>
    %10 = vector.multi_reduction <maximumf>, %8, %cst_7 [1] : vector<16x32xf32> to vector<16xf32>
    %11 = vector.shape_cast %10 : vector<16xf32> to vector<16x1xf32>
    %12 = vector.broadcast %11 : vector<16x1xf32> to vector<16x32xf32>
    %13 = arith.subf %8, %12 : vector<16x32xf32>
    %14 = math.exp %13 : vector<16x32xf32>
    %cst_8 = arith.constant dense<0.000000e+00> : vector<16xf32>
    %15 = vector.multi_reduction <add>, %14, %cst_8 [1] : vector<16x32xf32> to vector<16xf32>
    %16 = vector.shape_cast %15 : vector<16xf32> to vector<16x1xf32>
    %17 = math.log %16 : vector<16x1xf32>
    %18 = arith.addf %17, %11 : vector<16x1xf32>
    %19 = vector.broadcast %1 : vector<16x1xi32> to vector<16x32xi32>
    %20 = arith.cmpi eq, %2, %19 : vector<16x32xi32>
    %cst_9 = arith.constant 0.000000e+00 : f32
    %21 = vector.broadcast %cst_9 : f32 to vector<16x32xf32>
    %22 = arith.select %20, %8, %21 : vector<16x32xi1>, vector<16x32xf32>
    %cst_10 = arith.constant dense<0.000000e+00> : vector<16xf32>
    %23 = vector.multi_reduction <add>, %22, %cst_10 [1] : vector<16x32xf32> to vector<16xf32>
    %24 = vector.shape_cast %23 : vector<16xf32> to vector<16x1xf32>
    %25 = arith.subf %18, %24 : vector<16x1xf32>
    %c0_11 = arith.constant 0 : index
    %c0_12 = arith.constant 0 : index
    %26 = vector.load %arg5[%c0_11, %c0_12] : memref<16x1xf32, #tpu.memory_space<vmem>>, vector<16x1xf32>
    tpu.vector_store %arg5[%c0_11, %c0_12], %25 {strides = array<i32>} : memref<16x1xf32, #tpu.memory_space<vmem>>, vector<16x1xf32>,
    return
  }
  func.func @transform_0(%arg0: i32) -> (i32, i32) {
    %c0_i32 = arith.constant 0 : i32
    %c0_i32_0 = arith.constant 0 : i32
    return %arg0, %c0_i32 : i32, i32
  }
  func.func @transform_1(%arg0: i32) -> (i32, i32) {
    %c0_i32 = arith.constant 0 : i32
    %c0_i32_0 = arith.constant 0 : i32
    return %arg0, %c0_i32 : i32, i32
  }
  func.func @transform_2(%arg0: i32) -> (i32, i32) {
    %c0_i32 = arith.constant 0 : i32
    %c0_i32_0 = arith.constant 0 : i32
    %c0_i32_1 = arith.constant 0 : i32
    return %c0_i32, %c0_i32_0 : i32, i32
  }
  func.func @transform_3(%arg0: i32) -> (i32, i32) {
    %c0_i32 = arith.constant 0 : i32
    %c0_i32_0 = arith.constant 0 : i32
    return %arg0, %c0_i32 : i32, i32
  }
  func.func @transform_4(%arg0: i32) -> (i32, i32) {
    %c0_i32 = arith.constant 0 : i32
    %c0_i32_0 = arith.constant 0 : i32
    return %arg0, %c0_i32 : i32, i32
  }
}

</mosaic_0001>

<bundles_post_ra>
// kernel: tpu_custom_call.1
= control target key start
LH: loop header
LB: loop body
LE: loop exit
PB: predicated region body
PF: predicated region fallthrough
CT: control target
= control target key end

     0   :  { %v246_v1 = vmov 0   ;;  %s319_s0 = inlined_call_operand.vmem [shape: s32[16,1], index: 0, kind: input, shape index: {}]   ;;  %s320_s1 = inlined_call_operand.vmem [shape: s32[16,1], index: 1, kind: input, shape index: {}]   ;;  %s321_s2 = inlined_call_operand.vmem [shape: f32[32,32], index: 2, kind: input, shape index: {}]   ;;  %s322_s3 = inlined_call_operand.hbm [shape: f32[16,32], index: 3, kind: output, shape index: {0}]   ;;  %s323_s4 = inlined_call_operand.vmem [shape: f32[16,1], index: 4, kind: output, shape index: {1}]  }
   0x1   :  { %v17_v0 = vld [vmem:[%s319_s0] sm:$0xff]  ;;  %214 = vset.pattern.permute.xlu0 %v246_v1  ;;  %v38_v2 = vld [vmem:[%s321_s2 + $0x18] sm:$0xff]  ;;  %v37_v3 = vld [vmem:[%s321_s2 + $0x10] sm:$0xff]  ;;  %215 = vset.pattern.permute.xlu1 %v246_v1 }
   0x2   :  { %24 = vperm.xlu0 %214, %v17_v0   ;;  %198 = vmatprep.subr.mxu0 %v38_v2 }
   0x3   :  { %10 = vsyncpa [#allocation3], 0  ;;  %v18_v4 = vld [vmem:[%s319_s0 + $0x8] sm:$0xff]  ;;  %199 = vmatpush3.msra.mxu0 %v38_v2  ;;  %v35_v6 = vld [vmem:[%s321_s2] sm:$0xff]  ;;  %v21_v8 = vlaneseq  ;;  %vm39_vm0 = vcmask 261120   ;;  %v247_v11 = vmov 0.0  }
   0x4   :  { %v36_v5 = vld [vmem:[%s321_s2 + $0x8] sm:$0xff]  ;;  %200 = vmatprep.subr.mxu0 %v37_v3  ;;  %v19_v7 = vld [vmem:[%s320_s1] sm:$0xff] }
   0x5   :  { %201 = vmatpush3.msra.mxu0 %v37_v3  ;;  %v22_v9 = vand.u32 127, %v21_v8  ;;  %v20_v19 = vld [vmem:[%s320_s1 + $0x8] sm:$0xff]  ;;  %s248_s1 = smov [#allocation2]  }
   0x6   :  { %27 = vperm.xlu0 %214, %v18_v4   ;;  %202 = vmatprep.subr.mxu0 %v36_v5  ;;  %s173_s29 = sshll.u32 %s248_s1, 4  ;;  %s174_s29 = int_to_ptr.vmem [resolvable:$true] %s173_s29 }
   0x7   :  { %203 = vmatpush3.msra.mxu0 %v36_v5  ;;  %s224_s30 = scalar_lea.vmem %s174_s29, 256  ;;  %p229_p1 = scmp.lt.s32.totalorder %s174_s29, %s174_s29 }
   0x8   :  { %204 = vmatprep.subr.mxu0 %v35_v6  ;;  %p225_p0 = scmp.ne.s32.totalorder %s174_s29, %s224_s30  ;;  %p230_p2 = scmp.lt.s32.totalorder %s224_s30, %s224_s30 }
   0x9   :  { %205 = vmatpush3.msra.mxu0 %v35_v6 }
   0xa   :  { %148 = vperm.xlu0 %214, %v19_v7   ;;  %p231_p3 = por %p230_p2, %p229_p1 }
   0xc   :  { %p232_p4 = pnand %p231_p3, %p225_p0 }
  0x7d   :  { %v25_v10 = vpop.permute.xlu0 %24 }
  0x7e   :  { %vm29_vm1 = vcmp.eq.s32.totalorder %v22_v9, %v25_v10 }
  0x7f   :  { %v188_v12 = vsel %vm29_vm1, 1.0, %v247_v11 }
  0x80   :  { %206 = vmatprep.mubr.msk.f32.mxu0 %vm39_vm0, %v188_v12 }
  0x81   :  { %v28_v13 = vpop.permute.xlu0 %27 }
  0x82   :  { %vm30_vm2 = vcmp.eq.s32.totalorder %v22_v9, %v28_v13 }
  0x83   :  { %v189_v14 = vsel %vm30_vm2, 1.0, %v247_v11 }
  0x84   :  { %207 = vmatmul.mubr.msk.f32.vlgmr.msra.gmra.mxu0 %vm39_vm0, %v189_v14 }
  0x85   :  { %v149_v26 = vpop.permute.xlu0 %148 }
  0x86   :  { %vm153_vm3 = vcmp.eq.s32.totalorder %v22_v9, %v149_v26 }
 0x144   :  { %v208_v15 = vpop.f32.mrf.mxu0 }
 0x145   :  { %122 = vst.msk [vmem:[#allocation2 + $0x8] sm:$0xff] %vm39_vm0, %v208_v15  ;;  %v126_v18 = vsel %vm39_vm0, %v208_v15, -inf }
 0x146   :  { %v112_v16 = vpop.f32.mrf.mxu0 }
 0x147   :  { %121 = vst.msk [vmem:[#allocation2] sm:$0xff] %vm39_vm0, %v112_v16  ;;  %v123_v17 = vsel %vm39_vm0, %v112_v16, -inf  ;;  %v155_v30 = vsel %vm153_vm3, %v112_v16, 0.0 }
 0x148   :  { %124 = vmax.xlane.f32.xlu1 %v123_v17  ;;  %v157_v33 = vsel %vm39_vm0, %v155_v30, 0.0 }
 0x14c   :  { %127 = vmax.xlane.f32.xlu1 %v126_v18 }
 0x15d   :  { %151 = vperm.xlu1 %215, %v20_v19  }
 0x1d1   :  { %v125_v20 = vpop.xlane.xlu1 %124 }
 0x1d2   :  { %v129_v21 = vsub.f32 %v112_v16, %v125_v20 }
 0x1d4   :  { %v131_v22 = vmul.f32 1.442695, %v129_v21 }
 0x1d5   :  { %v128_v23 = vpop.xlane.xlu1 %127 }
 0x1d6   :  { %216 = vpow2.f32 %v131_v22  ;;  %v130_v24 = vsub.f32 %v208_v15, %v128_v23 }
 0x1d8   :  { %v133_v25 = vmul.f32 1.442695, %v130_v24 }
 0x1d9   :  { %v152_v28 = vpop.permute.xlu1 %151 }
 0x1da   :  { %218 = vpow2.f32 %v133_v25  ;;  %vm154_vm4 = vcmp.eq.s32.totalorder %v22_v9, %v152_v28 }
 0x1db   :  { %v156_v34 = vsel %vm154_vm4, %v208_v15, 0.0 }
 0x1dc   :  { %v160_v35 = vsel %vm39_vm0, %v156_v34, 0.0 }
 0x1e3   :  { %v217_v27 = vpop.eup %216 }
 0x1e4   :  { %v135_v29 = vsel %vm39_vm0, %v217_v27, 0.0 }
 0x1e5   :  { %136 = vadd.xlane.f32.xlu0 %v135_v29 }
 0x1e7   :  { %v219_v31 = vpop.eup %218 }
 0x1e8   :  { %v138_v32 = vsel %vm39_vm0, %v219_v31, 0.0 }
 0x1e9   :  { %139 = vadd.xlane.f32.xlu1 %v138_v32  ;;  %158 = vadd.xlane.f32.xlu0 %v157_v33 }
 0x1ed   :  { %161 = vadd.xlane.f32.xlu0 %v160_v35 }
 0x1ee   :  { %235 = shalt.err (!%p232_p4)
}
 0x1ef   :  { %s249_s5 = smov 128   ;;  %s250_s6 = smov 8   ;;  %vm165_vm5 = vcmask 7168  }
 0x1f0   :  { %179 = dma.vmem_to_hbm [thread:$0]  %s174_s29, 256, %s322_s3, [#allocation3], %s249_s5, %s249_s5, %s250_s6  }
 0x26e   :  { %v137_v36 = vpop.xlane.xlu0 %136 }
 0x26f   :  { %220 = vlog2.f32 %v137_v36 }
 0x272   :  { %v140_v37 = vpop.xlane.xlu1 %139  ;;  %v159_v40 = vpop.xlane.xlu0 %158 }
 0x273   :  { %222 = vlog2.f32 %v140_v37 }
 0x276   :  { %v162_v46 = vpop.xlane.xlu0 %161 }
 0x27c   :  { %v221_v38 = vpop.eup %220 }
 0x27d   :  { %v142_v39 = vmul.f32 0.6931472, %v221_v38 }
 0x27f   :  { %v145_v41 = vadd.f32 %v142_v39, %v125_v20 }
 0x280   :  { %v223_v42 = vpop.eup %222 }
 0x281   :  { %v144_v43 = vmul.f32 0.6931472, %v223_v42  ;;  %v163_v44 = vsub.f32 %v145_v41, %v159_v40 }
 0x283   :  { %166 = vst.msk [vmem:[%s323_s4] sm:$0xff] %vm165_vm5, %v163_v44  ;;  %v146_v45 = vadd.f32 %v144_v43, %v128_v23 }
 0x285   :  { %v164_v47 = vsub.f32 %v146_v45, %v162_v46 }
 0x287   :  { %167 = vst.msk [vmem:[%s323_s4 + $0x8] sm:$0xff] %vm165_vm5, %v164_v47 }
 0x288   :  { %244 = dma.done.wait [#allocation3], 256  }
 0x289   :  { %245 = vsyncadd [#allocation3], 4294967040 }
 0x28a   :  { %187 = vsyncpa [#allocation3], 1 }

</bundles_post_ra>
